<compile_context>
chip_gen: v6e
topology: v6e:2x2x1
jax: 0.10.0
libtpu: 0.0.40
codegen_flags: <defaults>
</compile_context>

<pallas_src>
import jax
import jax.numpy as jnp
from jax.experimental import pallas as pl
from jax.experimental.pallas import tpu as pltpu


_LANES = 128


def _round_up(x, m):
    return ((x + m - 1) // m) * m


def _choose_tile_rows(mp, n_branches, lane_width, itemsize, budget_bytes):
    """Pick the packed-row tile size from a VMEM budget.

    Budget per packed row: double-buffered feature blocks (N branches) +
    double-buffered output block + ~f32 intermediates (h, s, es, acc, ...).
    """
    bytes_per_row = (
        2 * n_branches * lane_width * itemsize        # feature blocks (x2 buffers)
        + 2 * lane_width * itemsize                   # output block (x2 buffers)
        + (3 * n_branches + 3) * lane_width * 4       # f32 intermediates
    )
    t = max(8, budget_bytes // bytes_per_row)
    t = min(t, 2048)                                  # ~8K original rows at P=4
    if mp >= 16:
        # Keep >= 2 grid steps so v7x's "parallel" axis can shard over both TCs.
        t = min(t, _round_up(pl.cdiv(mp, 2), 8))
    t = max(8, (t // 8) * 8)
    if t >= mp:
        return mp                                     # single full-extent block
    return t


def _make_attention_fusion_kernel(n_branches, matmul_dtype):
    def kernel(*refs):
        feat_refs = refs[:n_branches]                 # each (TMp, L), input dtype
        w1_ref = refs[n_branches]                     # (L, L)  block-diag W1, bf16
        b1_ref = refs[n_branches + 1]                 # (1, L)  tiled b1, f32
        w2_ref = refs[n_branches + 2]                 # (L, L)  block "broadcast" W2, bf16
        out_ref = refs[n_branches + 3]                # (TMp, L)

        w1 = w1_ref[...]
        b1 = b1_ref[...]
        w2 = w2_ref[...]

        # Per-branch scores. Because W2 is block-diagonal with each block equal to
        # w2 broadcast along columns, the score of each packed original row is
        # replicated across its own D-lane segment -- no lane-sparse columns and
        # the softmax weight is already broadcast for the weighted sum below.
        # NOTE: on a ragged last grid step the rows beyond M are garbage reads;
        # the math is purely row-wise so valid rows are untouched and the padded
        # rows are never stored.
        scores = []
        for n in range(n_branches):
            x_mm = feat_refs[n][...].astype(matmul_dtype)
            h = jnp.tanh(
                jnp.dot(x_mm, w1, preferred_element_type=jnp.float32) + b1
            )
            s = jnp.dot(h.astype(matmul_dtype), w2,
                        preferred_element_type=jnp.float32)
            scores.append(s)                          # (TMp, L), f32

        # Softmax over the static branch axis, fully unrolled elementwise (f32).
        m = scores[0]
        for n in range(1, n_branches):
            m = jnp.maximum(m, scores[n])
        es = [jnp.exp(s - m) for s in scores]
        denom = es[0]
        for n in range(1, n_branches):
            denom = denom + es[n]
        inv = pl.reciprocal(denom, approx=False)      # exact: keeps tolerance tight

        # Weighted sum over branches, f32 accumulator, no materialized f32 copy
        # of the inputs (re-read each branch block from VMEM).
        acc = feat_refs[0][...].astype(jnp.float32) * (es[0] * inv)
        for n in range(1, n_branches):
            acc = acc + feat_refs[n][...].astype(jnp.float32) * (es[n] * inv)
        out_ref[...] = acc.astype(out_ref.dtype)

    return kernel


def attention_fusion(features, w1, b1, w2, b2, *,
                     vmem_budget_bytes=20 * 1024 * 1024,
                     matmul_dtype=jnp.bfloat16):
    """features: list of N arrays, each (B, T, D). Returns (B, T, D).

    w1: (D, D), b1: (D,), w2: (D, 1), b2: (1,) -- right-multiply convention
    (y = x @ W + b, i.e. the transpose of torch's Linear weight layout).
    """
    del b2  # uniform shift across branches; cancels in the softmax
    n_branches = len(features)
    B, T, D = features[0].shape
    M = B * T

    # Lane-dense packing factor: P consecutive original rows per 128-lane row.
    if D < _LANES and _LANES % D == 0:
        pack = _LANES // D
    else:
        pack = 1                                      # D >= 128 (or awkward D): no repack
    L = pack * D

    # Free, contiguous reshapes (no HBM transpose / stack). Pad M to a multiple
    # of the packing factor only if needed.
    feats2d = [f.reshape(M, D) for f in features]
    pad = (-M) % pack
    if pad:
        feats2d = [jnp.pad(f, ((0, pad), (0, 0))) for f in feats2d]
    m_padded = M + pad
    mp = m_padded // pack
    feats_packed = [f.reshape(mp, L) for f in feats2d]

    # Block-diagonal score-MLP weights operating on the packed layout.
    eye_p = jnp.eye(pack, dtype=jnp.float32)
    w1_bd = jnp.kron(eye_p, w1.astype(jnp.float32)).astype(matmul_dtype)      # (L, L)
    b1_t = jnp.tile(b1.reshape(1, D).astype(jnp.float32), (1, pack))          # (1, L)
    w2_block = jnp.tile(w2.reshape(D, 1).astype(jnp.float32), (1, D))         # (D, D)
    w2_bd = jnp.kron(eye_p, w2_block).astype(matmul_dtype)                    # (L, L)

    itemsize = jnp.dtype(feats_packed[0].dtype).itemsize
    tmp_rows = _choose_tile_rows(mp, n_branches, L, itemsize, vmem_budget_bytes)
    grid = (pl.cdiv(mp, tmp_rows),)

    feat_specs = [
        # Double-buffering is sufficient at this tile size (>= ~1 MiB per branch
        # per step); pl.Buffered(3) would only help with tiny blocks.
        pl.BlockSpec((tmp_rows, L), lambda i: (i, 0))
        for _ in range(n_branches)
    ]
    weight_specs = [
        pl.BlockSpec((L, L), lambda i: (0, 0)),       # W1 block-diag, resident
        pl.BlockSpec((1, L), lambda i: (0, 0)),       # b1 tiled, resident
        pl.BlockSpec((L, L), lambda i: (0, 0)),       # W2 block, resident
    ]

    kernel = _make_attention_fusion_kernel(n_branches, matmul_dtype)

    out_packed = pl.pallas_call(
        kernel,
        out_shape=jax.ShapeDtypeStruct((mp, L), feats_packed[0].dtype),
        grid_spec=pltpu.PrefetchScalarGridSpec(
            num_scalar_prefetch=0,
            grid=grid,
            in_specs=feat_specs + weight_specs,
            out_specs=pl.BlockSpec((tmp_rows, L), lambda i: (i, 0)),
        ),
        compiler_params=pltpu.CompilerParams(
            dimension_semantics=("parallel",),        # v7x: shard row blocks over 2 TCs
            vmem_limit_bytes=32 * 1024 * 1024,        # explicit; tiles budgeted to ~20 MiB
        ),
    )(*feats_packed, w1_bd, b1_t, w2_bd)

    out = out_packed.reshape(m_padded, D)
    if pad:
        out = out[:M]
    return out.reshape(B, T, D)


def _reference(features, w1, b1, w2, b2):
    feats = jnp.stack(features, axis=2)               # (B, T, N, D)
    B, T, N, D = feats.shape
    flat = feats.reshape(-1, D)
    scores = jnp.tanh(flat @ w1 + b1) @ w2 + b2       # (-1, 1)
    scores = scores.reshape(B, T, N, 1)
    weights = jax.nn.softmax(scores, axis=2)
    return (feats * weights).sum(axis=2)


if __name__ == "__main__":
    key = jax.random.PRNGKey(0)
    B, T, D, N = 2, 8, 32, 3                          # feature_dim = 32, N fused branches

    k_feats, k_w1, k_b1, k_w2, k_b2 = jax.random.split(key, 5)
    features = [
        jax.random.normal(jax.random.fold_in(k_feats, n), (B, T, D), dtype=jnp.float32)
        for n in range(N)
    ]
    # Synthetic Linear(D,D) then Linear(D,1) params, right-multiply layout.
    w1 = jax.random.normal(k_w1, (D, D), dtype=jnp.float32) * 0.1
    b1 = jax.random.normal(k_b1, (D,), dtype=jnp.float32) * 0.1
    w2 = jax.random.normal(k_w2, (D, 1), dtype=jnp.float32) * 0.1
    b2 = jax.random.normal(k_b2, (1,), dtype=jnp.float32) * 0.1

    out = attention_fusion(features, w1, b1, w2, b2)
    out = jax.block_until_ready(out)

    ref = _reference(features, w1, b1, w2, b2)
    assert out.shape == (B, T, D)
    # Tolerance accounts for the bf16 MXU operands in the score MLP (the f32
    # reference uses exact f32 matmuls); softmax math itself is exact f32.
    assert jnp.allclose(out, ref, atol=2e-2, rtol=2e-2), "mismatch vs reference"

    print("KERNEL_OK")
</pallas_src>

<mosaic_0001>
module attributes {stable_mosaic.version = 11 : i64} {
  func.func @kernel(%arg0: i32, %arg1: memref<4x128xf32, #tpu.memory_space<vmem>>, %arg2: memref<4x128xf32, #tpu.memory_space<vmem>>, %arg3: memref<4x128xf32, #tpu.memory_space<vmem>>, %arg4: memref<128x128xbf16, #tpu.memory_space<vmem>>, %arg5: memref<1x128xf32, #tpu.memory_space<vmem>>, %arg6: memref<128x128xbf16, #tpu.memory_space<vmem>>, %arg7: memref<4x128xf32, #tpu.memory_space<vmem>>) attributes {dimension_semantics = [#tpu.dimension_semantics<parallel>], iteration_bounds = array<i64: 1>, scalar_prefetch = 0 : i64, scratch_operands = 0 : i64, tpu.core_type = #tpu.core_type<tc>, window_params = [{transform_indices = @transform_0, window_bounds = array<i64: 4, 128>}, {transform_indices = @transform_1, window_bounds = array<i64: 4, 128>}, {transform_indices = @transform_2, window_bounds = array<i64: 4, 128>}, {pipeline_mode = #tpu.pipeline_mode<synchronous>, transform_indices = @transform_3, window_bounds = array<i64: 128, 128>}, {pipeline_mode = #tpu.pipeline_mode<synchronous>, transform_indices = @transform_4, window_bounds = array<i64: 1, 128>}, {pipeline_mode = #tpu.pipeline_mode<synchronous>, transform_indices = @transform_5, window_bounds = array<i64: 128, 128>}, {transform_indices = @transform_6, window_bounds = array<i64: 4, 128>}]} {
    %c0 = arith.constant 0 : index
    %c0_0 = arith.constant 0 : index
    %0 = vector.load %arg4[%c0, %c0_0] : memref<128x128xbf16, #tpu.memory_space<vmem>>, vector<128x128xbf16>
    %c0_1 = arith.constant 0 : index
    %c0_2 = arith.constant 0 : index
    %1 = vector.load %arg5[%c0_1, %c0_2] : memref<1x128xf32, #tpu.memory_space<vmem>>, vector<1x128xf32>
    %c0_3 = arith.constant 0 : index
    %c0_4 = arith.constant 0 : index
    %2 = vector.load %arg6[%c0_3, %c0_4] : memref<128x128xbf16, #tpu.memory_space<vmem>>, vector<128x128xbf16>
    %c0_5 = arith.constant 0 : index
    %c0_6 = arith.constant 0 : index
    %3 = vector.load %arg1[%c0_5, %c0_6] : memref<4x128xf32, #tpu.memory_space<vmem>>, vector<4x128xf32>
    %4 = arith.truncf %3 : vector<4x128xf32> to vector<4x128xbf16>
    %cst = arith.constant dense<0.000000e+00> : vector<4x128xf32>
    %5 = tpu.matmul %4, %0, %cst {dimension_numbers = #tpu.dot_dimension_numbers<[1], [0], [0], [1], [0, 0, 1, 1], [], []>} : vector<4x128xbf16>, vector<128x128xbf16>, vector<4x128xf32> -> vector<4x128xf32>
    %6 = vector.broadcast %1 : vector<1x128xf32> to vector<4x128xf32>
    %7 = arith.addf %5, %6 : vector<4x128xf32>
    %8 = math.tanh %7 : vector<4x128xf32>
    %9 = arith.truncf %8 : vector<4x128xf32> to vector<4x128xbf16>
    %cst_7 = arith.constant dense<0.000000e+00> : vector<4x128xf32>
    %10 = tpu.matmul %9, %2, %cst_7 {dimension_numbers = #tpu.dot_dimension_numbers<[1], [0], [0], [1], [0, 0, 1, 1], [], []>} : vector<4x128xbf16>, vector<128x128xbf16>, vector<4x128xf32> -> vector<4x128xf32>
    %c0_8 = arith.constant 0 : index
    %c0_9 = arith.constant 0 : index
    %11 = vector.load %arg2[%c0_8, %c0_9] : memref<4x128xf32, #tpu.memory_space<vmem>>, vector<4x128xf32>
    %12 = arith.truncf %11 : vector<4x128xf32> to vector<4x128xbf16>
    %cst_10 = arith.constant dense<0.000000e+00> : vector<4x128xf32>
    %13 = tpu.matmul %12, %0, %cst_10 {dimension_numbers = #tpu.dot_dimension_numbers<[1], [0], [0], [1], [0, 0, 1, 1], [], []>} : vector<4x128xbf16>, vector<128x128xbf16>, vector<4x128xf32> -> vector<4x128xf32>
    %14 = vector.broadcast %1 : vector<1x128xf32> to vector<4x128xf32>
    %15 = arith.addf %13, %14 : vector<4x128xf32>
    %16 = math.tanh %15 : vector<4x128xf32>
    %17 = arith.truncf %16 : vector<4x128xf32> to vector<4x128xbf16>
    %cst_11 = arith.constant dense<0.000000e+00> : vector<4x128xf32>
    %18 = tpu.matmul %17, %2, %cst_11 {dimension_numbers = #tpu.dot_dimension_numbers<[1], [0], [0], [1], [0, 0, 1, 1], [], []>} : vector<4x128xbf16>, vector<128x128xbf16>, vector<4x128xf32> -> vector<4x128xf32>
    %c0_12 = arith.constant 0 : index
    %c0_13 = arith.constant 0 : index
    %19 = vector.load %arg3[%c0_12, %c0_13] : memref<4x128xf32, #tpu.memory_space<vmem>>, vector<4x128xf32>
    %20 = arith.truncf %19 : vector<4x128xf32> to vector<4x128xbf16>
    %cst_14 = arith.constant dense<0.000000e+00> : vector<4x128xf32>
    %21 = tpu.matmul %20, %0, %cst_14 {dimension_numbers = #tpu.dot_dimension_numbers<[1], [0], [0], [1], [0, 0, 1, 1], [], []>} : vector<4x128xbf16>, vector<128x128xbf16>, vector<4x128xf32> -> vector<4x128xf32>
    %22 = vector.broadcast %1 : vector<1x128xf32> to vector<4x128xf32>
    %23 = arith.addf %21, %22 : vector<4x128xf32>
    %24 = math.tanh %23 : vector<4x128xf32>
    %25 = arith.truncf %24 : vector<4x128xf32> to vector<4x128xbf16>
    %cst_15 = arith.constant dense<0.000000e+00> : vector<4x128xf32>
    %26 = tpu.matmul %25, %2, %cst_15 {dimension_numbers = #tpu.dot_dimension_numbers<[1], [0], [0], [1], [0, 0, 1, 1], [], []>} : vector<4x128xbf16>, vector<128x128xbf16>, vector<4x128xf32> -> vector<4x128xf32>
    %27 = arith.maximumf %10, %18 : vector<4x128xf32>
    %28 = arith.maximumf %27, %26 : vector<4x128xf32>
    %29 = arith.subf %10, %28 : vector<4x128xf32>
    %30 = math.exp %29 : vector<4x128xf32>
    %31 = arith.subf %18, %28 : vector<4x128xf32>
    %32 = math.exp %31 : vector<4x128xf32>
    %33 = arith.subf %26, %28 : vector<4x128xf32>
    %34 = math.exp %33 : vector<4x128xf32>
    %35 = arith.addf %30, %32 : vector<4x128xf32>
    %36 = arith.addf %35, %34 : vector<4x128xf32>
    %37 = tpu.reciprocal %36 : vector<4x128xf32> -> vector<4x128xf32>
    %c0_16 = arith.constant 0 : index
    %c0_17 = arith.constant 0 : index
    %38 = vector.load %arg1[%c0_16, %c0_17] : memref<4x128xf32, #tpu.memory_space<vmem>>, vector<4x128xf32>
    %39 = arith.mulf %30, %37 : vector<4x128xf32>
    %40 = arith.mulf %38, %39 : vector<4x128xf32>
    %c0_18 = arith.constant 0 : index
    %c0_19 = arith.constant 0 : index
    %41 = vector.load %arg2[%c0_18, %c0_19] : memref<4x128xf32, #tpu.memory_space<vmem>>, vector<4x128xf32>
    %42 = arith.mulf %32, %37 : vector<4x128xf32>
    %43 = arith.mulf %41, %42 : vector<4x128xf32>
    %44 = arith.addf %40, %43 : vector<4x128xf32>
    %c0_20 = arith.constant 0 : index
    %c0_21 = arith.constant 0 : index
    %45 = vector.load %arg3[%c0_20, %c0_21] : memref<4x128xf32, #tpu.memory_space<vmem>>, vector<4x128xf32>
    %46 = arith.mulf %34, %37 : vector<4x128xf32>
    %47 = arith.mulf %45, %46 : vector<4x128xf32>
    %48 = arith.addf %44, %47 : vector<4x128xf32>
    %c0_22 = arith.constant 0 : index
    %c0_23 = arith.constant 0 : index
    %49 = vector.load %arg7[%c0_22, %c0_23] : memref<4x128xf32, #tpu.memory_space<vmem>>, vector<4x128xf32>
    tpu.vector_store %arg7[%c0_22, %c0_23], %48 {strides = array<i32>} : memref<4x128xf32, #tpu.memory_space<vmem>>, vector<4x128xf32>,
    return
  }
  func.func @transform_0(%arg0: i32) -> (i32, i32) {
    %c0_i32 = arith.constant 0 : i32
    %c0_i32_0 = arith.constant 0 : i32
    return %arg0, %c0_i32 : i32, i32
  }
  func.func @transform_1(%arg0: i32) -> (i32, i32) {
    %c0_i32 = arith.constant 0 : i32
    %c0_i32_0 = arith.constant 0 : i32
    return %arg0, %c0_i32 : i32, i32
  }
  func.func @transform_2(%arg0: i32) -> (i32, i32) {
    %c0_i32 = arith.constant 0 : i32
    %c0_i32_0 = arith.constant 0 : i32
    return %arg0, %c0_i32 : i32, i32
  }
  func.func @transform_3(%arg0: i32) -> (i32, i32) {
    %c0_i32 = arith.constant 0 : i32
    %c0_i32_0 = arith.constant 0 : i32
    %c0_i32_1 = arith.constant 0 : i32
    return %c0_i32, %c0_i32_0 : i32, i32
  }
  func.func @transform_4(%arg0: i32) -> (i32, i32) {
    %c0_i32 = arith.constant 0 : i32
    %c0_i32_0 = arith.constant 0 : i32
    %c0_i32_1 = arith.constant 0 : i32
    return %c0_i32, %c0_i32_0 : i32, i32
  }
  func.func @transform_5(%arg0: i32) -> (i32, i32) {
    %c0_i32 = arith.constant 0 : i32
    %c0_i32_0 = arith.constant 0 : i32
    %c0_i32_1 = arith.constant 0 : i32
    return %c0_i32, %c0_i32_0 : i32, i32
  }
  func.func @transform_6(%arg0: i32) -> (i32, i32) {
    %c0_i32 = arith.constant 0 : i32
    %c0_i32_0 = arith.constant 0 : i32
    return %arg0, %c0_i32 : i32, i32
  }
}

</mosaic_0001>

<bundles_post_ra>
// kernel: tpu_custom_call.1
= control target key start
LH: loop header
LB: loop body
LE: loop exit
PB: predicated region body
PF: predicated region fallthrough
CT: control target
= control target key end

     0   :  { %11 = vsyncpa [#allocation3], 0  ;;  %s1035_s0 = inlined_call_operand.hbm [shape: f32[4,128], index: 0, kind: input, shape index: {}]   ;;  %s1036_s1 = inlined_call_operand.hbm [shape: f32[4,128], index: 1, kind: input, shape index: {}]   ;;  %s1037_s2 = inlined_call_operand.hbm [shape: f32[4,128], index: 2, kind: input, shape index: {}]   ;;  %s1038_s3 = inlined_call_operand.hbm [shape: bf16[128,128], index: 3, kind: input, shape index: {}]   ;;  %s1039_s4 = inlined_call_operand.vmem [shape: f32[1,128], index: 4, kind: input, shape index: {}]   ;;  %s1040_s5 = inlined_call_operand.hbm [shape: bf16[128,128], index: 5, kind: input, shape index: {}]   ;;  %s1041_s6 = inlined_call_operand.hbm [shape: f32[4,128], index: 6, kind: output, shape index: {}]  }
   0x1   :  { %12 = vsyncpa [#allocation6], 0 }
   0x2   :  { %13 = vsyncpa [#allocation9], 0 }
   0x3   :  { %14 = vsyncpa [#allocation4], 0  ;;  %s873_s21 = smov [#allocation5]   ;;  %s874_s23 = smov [#allocation8]  }
   0x4   :  { %s31_s22 = sshll.u32 %s873_s21, 4  ;;  %s50_s24 = sshll.u32 %s874_s23, 4  ;;  %s32_s22 = int_to_ptr.vmem [resolvable:$true] %s31_s22  ;;  %s51_s24 = int_to_ptr.vmem [resolvable:$true] %s50_s24 }
   0x5   :  { %s753_s25 = scalar_lea.vmem %s32_s22, 64  ;;  %p758_p1 = scmp.lt.s32.totalorder %s32_s22, %s32_s22 }
   0x6   :  { %p754_p0 = scmp.ne.s32.totalorder %s32_s22, %s753_s25  ;;  %p759_p2 = scmp.lt.s32.totalorder %s753_s25, %s753_s25 }
   0x8   :  { %p760_p3 = por %p759_p2, %p758_p1 }
   0xa   :  { %p761_p4 = pnand %p760_p3, %p754_p0 }
   0xc   :  { %764 = shalt.err (!%p761_p4)
}
   0xd   :  { %34 = dma.hbm_to_vmem [thread:$0]  %s1036_s1, 64, %s32_s22, [#allocation6]  }
   0xe   :  { %s773_s28 = scalar_lea.vmem %s51_s24, 1024  ;;  %p778_p6 = scmp.lt.s32.totalorder %s51_s24, %s51_s24 }
   0xf   :  { %p774_p5 = scmp.ne.s32.totalorder %s51_s24, %s773_s28  ;;  %p779_p7 = scmp.lt.s32.totalorder %s773_s28, %s773_s28 }
  0x11   :  { %p780_p8 = por %p779_p7, %p778_p6 }
  0x13   :  { %p781_p9 = pnand %p780_p8, %p774_p5 }
  0x15   :  { %784 = shalt.err (!%p781_p9)
}
  0x16   :  { %s875_s29 = smov 64   ;;  %s876_s30 = smov 4  }
  0x17   :  { %56 = dma.hbm_to_vmem [thread:$0]  %s1038_s3, 1024, %s51_s24, [#allocation9], %s875_s29, %s875_s29, %s876_s30  }
  0x18   :  { %s877_s9 = smov [#allocation2]   ;;  %s878_s11 = smov [#allocation7]  }
  0x19   :  { %s21_s10 = sshll.u32 %s877_s9, 4  ;;  %s41_s1 = sshll.u32 %s878_s11, 4  ;;  %s22_s10 = int_to_ptr.vmem [resolvable:$true] %s21_s10  ;;  %s42_s1 = int_to_ptr.vmem [resolvable:$true] %s41_s1 }
  0x1a   :  { %s793_s12 = scalar_lea.vmem %s22_s10, 64  ;;  %p798_p11 = scmp.lt.s32.totalorder %s22_s10, %s22_s10 }
  0x1b   :  { %p794_p10 = scmp.ne.s32.totalorder %s22_s10, %s793_s12  ;;  %p799_p12 = scmp.lt.s32.totalorder %s793_s12, %s793_s12 }
  0x1d   :  { %p800_p13 = por %p799_p12, %p798_p11 }
  0x1f   :  { %p801_p0 = pnand %p800_p13, %p794_p10 }
  0x21   :  { %804 = shalt.err (!%p801_p0)
}
  0x22   :  { %24 = dma.hbm_to_vmem [thread:$0]  %s1035_s0, 64, %s22_s10, [#allocation3]  }
  0x23   :  { %s813_s15 = scalar_lea.vmem %s42_s1, 64  ;;  %p818_p2 = scmp.lt.s32.totalorder %s42_s1, %s42_s1 }
  0x24   :  { %p814_p1 = scmp.ne.s32.totalorder %s42_s1, %s813_s15  ;;  %p819_p3 = scmp.lt.s32.totalorder %s813_s15, %s813_s15 }
  0x26   :  { %p820_p4 = por %p819_p3, %p818_p2 }
  0x28   :  { %p821_p5 = pnand %p820_p4, %p814_p1 }
  0x2a   :  { %824 = shalt.err (!%p821_p5)
}
  0x2b   :  { %44 = dma.hbm_to_vmem [thread:$0]  %s1037_s2, 64, %s42_s1, [#allocation6]  }
  0x2c   :  { %s879_s17 = smov [#allocation10]  }
  0x2d   :  { %s64_s18 = sshll.u32 %s879_s17, 4  ;;  %s65_s18 = int_to_ptr.vmem [resolvable:$true] %s64_s18 }
  0x2e   :  { %s833_s19 = scalar_lea.vmem %s65_s18, 1024  ;;  %p838_p7 = scmp.lt.s32.totalorder %s65_s18, %s65_s18 }
  0x2f   :  { %p834_p6 = scmp.ne.s32.totalorder %s65_s18, %s833_s19  ;;  %p839_p8 = scmp.lt.s32.totalorder %s833_s19, %s833_s19 }
  0x31   :  { %p840_p9 = por %p839_p8, %p838_p7 }
  0x33   :  { %p841_p10 = pnand %p840_p9, %p834_p6 }
  0x35   :  { %844 = shalt.err (!%p841_p10)
}
  0x36   :  { %70 = dma.hbm_to_vmem [thread:$0]  %s1040_s5, 1024, %s65_s18, [#allocation9], %s875_s29, %s875_s29, %s876_s30  }
  0x37   :  { %865 = dma.done.wait [#allocation3], 64  }
  0x38   :  { %866 = vsyncadd [#allocation3], 4294967232 }
  0x39   :  { %867 = dma.done.wait [#allocation6], 128  }
  0x3a   :  { %868 = vsyncadd [#allocation6], 4294967168 }
  0x3b   :  { %869 = dma.done.wait [#allocation9], 2048  }
  0x3c   :  { %870 = vsyncadd [#allocation9], 4294965248  ;;  %v880_v0 = vmov 0.0   ;;  %vm881_vm0 = vmmov 0   ;;  %v715_v1 = vld [vmem:[#allocation8 + $0x38] sm:$0xff]   ;;  %v716_v2 = vld [vmem:[#allocation8 + $0x30] sm:$0xff]  }
  0x3d   :  { %585 = vmatprep.subr.bf16.mxu0 %v880_v0  ;;  %601 = vmatprep.mubr.msk.bf16.mxu0 %vm881_vm0, %v880_v0  ;;  %v717_v3 = vld [vmem:[#allocation8 + $0x28] sm:$0xff]   ;;  %v947_v4 = vld [vmem:[#allocation10 + $0x38] sm:$0xff]   ;;  %v718_v5 = vld [vmem:[#allocation8 + $0x20] sm:$0xff]  }
  0x3e   :  { %605 = vmatprep.subr.bf16.mxu1 %v880_v0  ;;  %621 = vmatprep.mubr.msk.bf16.mxu1 %vm881_vm0, %v880_v0  ;;  %v951_v6 = vld [vmem:[#allocation10 + $0x30] sm:$0xff]   ;;  %v719_v7 = vld [vmem:[#allocation8 + $0x18] sm:$0xff]   ;;  %v956_v8 = vld [vmem:[#allocation10 + $0x28] sm:$0xff]  }
  0x3f   :  { %586 = vmatpush3.bf16.msra.mxu0 %v715_v1  ;;  %606 = vmatpush3.bf16.msra.mxu1 %v947_v4  ;;  %v720_v9 = vld [vmem:[#allocation8 + $0x10] sm:$0xff]   ;;  %v721_v10 = vld [vmem:[#allocation8 + $0x8] sm:$0xff]   ;;  %v722_v11 = vld [vmem:[#allocation8] sm:$0xff]  }
  0x40   :  { %587 = vmatprep.subr.bf16.mxu0 %v880_v0  ;;  %607 = vmatprep.subr.bf16.mxu1 %v880_v0  ;;  %v963_v12 = vld [vmem:[#allocation2] sm:$0xf]  ;;  %v977_v14 = vld [vmem:[#allocation5] sm:$0xf]  ;;  %v991_v16 = vld [vmem:[#allocation7] sm:$0xf] }
  0x41   :  { %v121_v13 = vpack.c.bf16 %v963_v12, %v963_v12  ;;  %v307_v15 = vpack.c.bf16 %v977_v14, %v977_v14  ;;  %v391_v17 = vpack.c.bf16 %v991_v16, %v991_v16  ;;  %v726_v18 = vld [vmem:[#allocation10 + $0x20] sm:$0xff]   ;;  %v727_v19 = vld [vmem:[#allocation10 + $0x18] sm:$0xff]   ;;  %v728_v20 = vld [vmem:[#allocation10 + $0x10] sm:$0xff]  }
  0x42   :  { %v729_v21 = vld [vmem:[#allocation10 + $0x8] sm:$0xff]   ;;  %v730_v22 = vld [vmem:[#allocation10] sm:$0xff]   ;;  %v514_v23 = vld [vmem:[%s1039_s4] ss:$0 sm:$0xff]  ;;  %s882_s4 = smov [#allocation11]  }
  0x43   :  { %588 = vmatpush3.bf16.msra.mxu0 %v716_v2  ;;  %608 = vmatpush3.bf16.msra.mxu1 %v951_v6  ;;  %s503_s21 = sshll.u32 %s882_s4, 4  ;;  %s504_s21 = int_to_ptr.vmem [resolvable:$true] %s503_s21 }
  0x44   :  { %589 = vmatprep.subr.bf16.mxu0 %v880_v0  ;;  %609 = vmatprep.subr.bf16.mxu1 %v880_v0  ;;  %s845_s22 = scalar_lea.vmem %s504_s21, 64  ;;  %p850_p12 = scmp.lt.s32.totalorder %s504_s21, %s504_s21 }
  0x45   :  { %p846_p11 = scmp.ne.s32.totalorder %s504_s21, %s845_s22  ;;  %p851_p13 = scmp.lt.s32.totalorder %s845_s22, %s845_s22 }
  0x47   :  { %590 = vmatpush3.bf16.msra.mxu0 %v717_v3  ;;  %610 = vmatpush3.bf16.msra.mxu1 %v956_v8  ;;  %p852_p0 = por %p851_p13, %p850_p12 }
  0x48   :  { %591 = vmatprep.subr.bf16.mxu0 %v880_v0  ;;  %611 = vmatprep.subr.bf16.mxu1 %v880_v0 }
  0x49   :  { %p853_p1 = pnand %p852_p0, %p846_p11 }
  0x4b   :  { %592 = vmatpush3.bf16.msra.mxu0 %v718_v5  ;;  %612 = vmatpush3.bf16.msra.mxu1 %v726_v18 }
  0x4c   :  { %593 = vmatprep.subr.bf16.mxu0 %v880_v0  ;;  %613 = vmatprep.subr.bf16.mxu1 %v880_v0 }
  0x4f   :  { %594 = vmatpush3.bf16.msra.mxu0 %v719_v7  ;;  %614 = vmatpush3.bf16.msra.mxu1 %v727_v19 }
  0x50   :  { %595 = vmatprep.subr.bf16.mxu0 %v880_v0  ;;  %615 = vmatprep.subr.bf16.mxu1 %v880_v0 }
  0x53   :  { %596 = vmatpush3.bf16.msra.mxu0 %v720_v9  ;;  %616 = vmatpush3.bf16.msra.mxu1 %v728_v20 }
  0x54   :  { %597 = vmatprep.subr.bf16.mxu0 %v880_v0  ;;  %617 = vmatprep.subr.bf16.mxu1 %v880_v0 }
  0x57   :  { %598 = vmatpush3.bf16.msra.mxu0 %v721_v10  ;;  %618 = vmatpush3.bf16.msra.mxu1 %v729_v21 }
  0x58   :  { %599 = vmatprep.subr.bf16.mxu0 %v880_v0  ;;  %619 = vmatprep.subr.bf16.mxu1 %v880_v0 }
  0x5b   :  { %600 = vmatpush3.bf16.msra.mxu0 %v722_v11  ;;  %620 = vmatpush3.bf16.msra.mxu1 %v730_v22 }
  0x5c   :  { %625 = vmatprep.subr.bf16.mxu0 %v880_v0  ;;  %645 = vmatprep.subr.bf16.mxu1 %v880_v0 }
  0x5e   :  { %602 = vmatmul.mubr.bf16.vlgmr.msra.gmra.mxu0 %v121_v13 }
  0x5f   :  { %626 = vmatpush3.bf16.msra.mxu0 %v715_v1  ;;  %641 = vmatprep.mubr.msk.bf16.mxu0 %vm881_vm0, %v880_v0 }
  0x60   :  { %627 = vmatprep.subr.bf16.mxu0 %v880_v0 }
  0x63   :  { %628 = vmatpush3.bf16.msra.mxu0 %v716_v2 }
  0x64   :  { %629 = vmatprep.subr.bf16.mxu0 %v880_v0 }
  0x67   :  { %630 = vmatpush3.bf16.msra.mxu0 %v717_v3 }
  0x68   :  { %631 = vmatprep.subr.bf16.mxu0 %v880_v0 }
  0x6b   :  { %632 = vmatpush3.bf16.msra.mxu0 %v718_v5 }
  0x6c   :  { %633 = vmatprep.subr.bf16.mxu0 %v880_v0 }
  0x6f   :  { %634 = vmatpush3.bf16.msra.mxu0 %v719_v7 }
  0x70   :  { %635 = vmatprep.subr.bf16.mxu0 %v880_v0 }
  0x73   :  { %636 = vmatpush3.bf16.msra.mxu0 %v720_v9 }
  0x74   :  { %637 = vmatprep.subr.bf16.mxu0 %v880_v0 }
  0x77   :  { %638 = vmatpush3.bf16.msra.mxu0 %v721_v10 }
  0x78   :  { %639 = vmatprep.subr.bf16.mxu0 %v880_v0 }
  0x7b   :  { %640 = vmatpush3.bf16.msra.mxu0 %v722_v11 }
  0x7c   :  { %665 = vmatprep.subr.bf16.mxu0 %v880_v0 }
  0x7e   :  { %642 = vmatmul.mubr.bf16.vlgmr.msra.gmra.mxu0 %v307_v15 }
  0x7f   :  { %666 = vmatpush3.bf16.msra.mxu0 %v715_v1  ;;  %681 = vmatprep.mubr.msk.bf16.mxu0 %vm881_vm0, %v880_v0 }
  0x80   :  { %667 = vmatprep.subr.bf16.mxu0 %v880_v0 }
  0x83   :  { %668 = vmatpush3.bf16.msra.mxu0 %v716_v2 }
  0x84   :  { %669 = vmatprep.subr.bf16.mxu0 %v880_v0 }
  0x87   :  { %670 = vmatpush3.bf16.msra.mxu0 %v717_v3 }
  0x88   :  { %671 = vmatprep.subr.bf16.mxu0 %v880_v0 }
  0x8b   :  { %672 = vmatpush3.bf16.msra.mxu0 %v718_v5 }
  0x8c   :  { %673 = vmatprep.subr.bf16.mxu0 %v880_v0 }
  0x8f   :  { %674 = vmatpush3.bf16.msra.mxu0 %v719_v7 }
  0x90   :  { %675 = vmatprep.subr.bf16.mxu0 %v880_v0 }
  0x93   :  { %676 = vmatpush3.bf16.msra.mxu0 %v720_v9 }
  0x94   :  { %677 = vmatprep.subr.bf16.mxu0 %v880_v0 }
  0x97   :  { %678 = vmatpush3.bf16.msra.mxu0 %v721_v10 }
  0x98   :  { %679 = vmatprep.subr.bf16.mxu0 %v880_v0 }
  0x9b   :  { %680 = vmatpush3.bf16.msra.mxu0 %v722_v11 }
  0x9e   :  { %682 = vmatmul.mubr.bf16.vlgmr.msra.gmra.mxu0 %v391_v17 }
 0x11e   :  { %v210_v24 = vpop.f32.mrf.mxu0 }
 0x11f   :  { %v211_v25 = vadd.f32 %v514_v23, %v210_v24 }
 0x120   :  { %v603_v26 = vpop.f32.mrf.mxu0 }
 0x121   :  { %731 = vtanh.f32 %v211_v25 }
 0x122   :  { %v213_v27 = vpop.f32.mrf.mxu0 }
 0x124   :  { %v604_v28 = vpop.f32.mrf.mxu0 }
 0x12e   :  { %v732_v29 = vpop.eup %731 }
 0x12f   :  { %v217_v30 = vpack.c.bf16 %v732_v29, %v732_v29 }
 0x131   :  { %622 = vmatmul.mubr.bf16.vlgmr.msra.gmra.mxu1 %v217_v30 }
 0x132   :  { %646 = vmatpush3.bf16.msra.mxu1 %v947_v4  ;;  %661 = vmatprep.mubr.msk.bf16.mxu1 %vm881_vm0, %v880_v0 }
 0x133   :  { %647 = vmatprep.subr.bf16.mxu1 %v880_v0 }
 0x136   :  { %648 = vmatpush3.bf16.msra.mxu1 %v951_v6 }
 0x137   :  { %649 = vmatprep.subr.bf16.mxu1 %v880_v0 }
 0x13a   :  { %650 = vmatpush3.bf16.msra.mxu1 %v956_v8 }
 0x13b   :  { %651 = vmatprep.subr.bf16.mxu1 %v880_v0 }
 0x13e   :  { %v342_v31 = vpop.f32.mrf.mxu0  ;;  %652 = vmatpush3.bf16.msra.mxu1 %v726_v18 }
 0x13f   :  { %v343_v32 = vadd.f32 %v514_v23, %v342_v31  ;;  %653 = vmatprep.subr.bf16.mxu1 %v880_v0 }
 0x140   :  { %v643_v33 = vpop.f32.mrf.mxu0 }
 0x141   :  { %733 = vtanh.f32 %v343_v32 }
 0x142   :  { %v345_v34 = vpop.f32.mrf.mxu0  ;;  %654 = vmatpush3.bf16.msra.mxu1 %v727_v19 }
 0x143   :  { %655 = vmatprep.subr.bf16.mxu1 %v880_v0 }
 0x144   :  { %v644_v35 = vpop.f32.mrf.mxu0 }
 0x146   :  { %656 = vmatpush3.bf16.msra.mxu1 %v728_v20 }
 0x147   :  { %657 = vmatprep.subr.bf16.mxu1 %v880_v0 }
 0x14a   :  { %658 = vmatpush3.bf16.msra.mxu1 %v729_v21 }
 0x14b   :  { %659 = vmatprep.subr.bf16.mxu1 %v880_v0 }
 0x14e   :  { %v734_v36 = vpop.eup %733  ;;  %660 = vmatpush3.bf16.msra.mxu1 %v730_v22 }
 0x14f   :  { %v349_v37 = vpack.c.bf16 %v734_v36, %v734_v36  ;;  %685 = vmatprep.subr.bf16.mxu1 %v880_v0 }
 0x151   :  { %662 = vmatmul.mubr.bf16.vlgmr.msra.gmra.mxu1 %v349_v37 }
 0x152   :  { %686 = vmatpush3.bf16.msra.mxu1 %v947_v4  ;;  %701 = vmatprep.mubr.msk.bf16.mxu1 %vm881_vm0, %v880_v0 }
 0x153   :  { %687 = vmatprep.subr.bf16.mxu1 %v880_v0 }
 0x156   :  { %688 = vmatpush3.bf16.msra.mxu1 %v951_v6 }
 0x157   :  { %689 = vmatprep.subr.bf16.mxu1 %v880_v0 }
 0x15a   :  { %690 = vmatpush3.bf16.msra.mxu1 %v956_v8 }
 0x15b   :  { %691 = vmatprep.subr.bf16.mxu1 %v880_v0 }
 0x15e   :  { %v426_v38 = vpop.f32.mrf.mxu0  ;;  %692 = vmatpush3.bf16.msra.mxu1 %v726_v18 }
 0x15f   :  { %v427_v39 = vadd.f32 %v514_v23, %v426_v38  ;;  %693 = vmatprep.subr.bf16.mxu1 %v880_v0 }
 0x160   :  { %v683_v40 = vpop.f32.mrf.mxu0 }
 0x161   :  { %735 = vtanh.f32 %v427_v39 }
 0x162   :  { %v429_v41 = vpop.f32.mrf.mxu0  ;;  %694 = vmatpush3.bf16.msra.mxu1 %v727_v19 }
 0x163   :  { %695 = vmatprep.subr.bf16.mxu1 %v880_v0 }
 0x164   :  { %v684_v42 = vpop.f32.mrf.mxu0 }
 0x166   :  { %696 = vmatpush3.bf16.msra.mxu1 %v728_v20 }
 0x167   :  { %697 = vmatprep.subr.bf16.mxu1 %v880_v0 }
 0x16a   :  { %698 = vmatpush3.bf16.msra.mxu1 %v729_v21 }
 0x16b   :  { %699 = vmatprep.subr.bf16.mxu1 %v880_v0 }
 0x16e   :  { %v736_v43 = vpop.eup %735  ;;  %700 = vmatpush3.bf16.msra.mxu1 %v730_v22 }
 0x16f   :  { %v433_v44 = vpack.c.bf16 %v736_v43, %v736_v43 }
 0x171   :  { %702 = vmatmul.mubr.bf16.vlgmr.msra.gmra.mxu1 %v433_v44 }
 0x1f1   :  { %v300_v45 = vpop.f32.mrf.mxu1 }
 0x1f3   :  { %v623_v46 = vpop.f32.mrf.mxu1 }
 0x1f5   :  { %v303_v47 = vpop.f32.mrf.mxu1 }
 0x1f7   :  { %v624_v48 = vpop.f32.mrf.mxu1 }
 0x211   :  { %v384_v49 = vpop.f32.mrf.mxu1 }
 0x212   :  { %v474_v53 = vmax.f32 %v300_v45, %v384_v49 }
 0x213   :  { %v663_v50 = vpop.f32.mrf.mxu1 }
 0x215   :  { %v387_v51 = vpop.f32.mrf.mxu1 }
 0x217   :  { %v664_v52 = vpop.f32.mrf.mxu1 }
 0x231   :  { %v468_v54 = vpop.f32.mrf.mxu1 }
 0x232   :  { %v475_v55 = vmax.f32 %v474_v53, %v468_v54 }
 0x233   :  { %v703_v56 = vpop.f32.mrf.mxu1 }
 0x234   :  { %v476_v57 = vsub.f32 %v300_v45, %v475_v55  ;;  %v479_v58 = vsub.f32 %v384_v49, %v475_v55  ;;  %v482_v59 = vsub.f32 %v468_v54, %v475_v55 }
 0x235   :  { %v471_v60 = vpop.f32.mrf.mxu1 }
 0x236   :  { %v477_v61 = vmul.f32 1.442695, %v476_v57  ;;  %v480_v62 = vmul.f32 1.442695, %v479_v58  ;;  %v483_v63 = vmul.f32 1.442695, %v482_v59 }
 0x237   :  { %v704_v0 = vpop.f32.mrf.mxu1 }
 0x238   :  { %737 = vpow2.f32 %v477_v61 }
 0x239   :  { %739 = vpow2.f32 %v480_v62 }
 0x23a   :  { %741 = vpow2.f32 %v483_v63 }
 0x245   :  { %v738_v1 = vpop.eup %737 }
 0x246   :  { %v740_v2 = vpop.eup %739 }
 0x247   :  { %v485_v3 = vadd.f32 %v740_v2, %v738_v1  ;;  %v742_v4 = vpop.eup %741 }
 0x249   :  { %v486_v5 = vadd.f32 %v742_v4, %v485_v3 }
 0x24b   :  { %743 = vrcp.f32 %v486_v5 }
 0x258   :  { %v744_v6 = vpop.eup %743 }
 0x259   :  { %v488_v7 = vmul.f32 %v744_v6, %v738_v1  ;;  %v490_v8 = vmul.f32 %v744_v6, %v740_v2  ;;  %v493_v9 = vmul.f32 %v744_v6, %v742_v4 }
 0x25b   :  { %v489_v10 = vmul.f32 %v488_v7, %v963_v12  ;;  %v491_v11 = vmul.f32 %v490_v8, %v977_v14  ;;  %v494_v15 = vmul.f32 %v493_v9, %v991_v16 }
 0x25d   :  { %v492_v13 = vadd.f32 %v491_v11, %v489_v10 }
 0x25f   :  { %v495_v17 = vadd.f32 %v494_v15, %v492_v13 }
 0x261   :  { %496 = vst [vmem:[#allocation11] sm:$0xf] %v495_v17 }
 0x262   :  { %856 = shalt.err (!%p853_p1)
}
 0x263   :  { %506 = dma.vmem_to_hbm [thread:$0]  %s504_s21, 64, %s1041_s6, [#allocation4]  }
 0x264   :  { %871 = dma.done.wait [#allocation4], 64  }
 0x265   :  { %872 = vsyncadd [#allocation4], 4294967232 }
 0x266   :  { %510 = vsyncpa [#allocation3], 1 }
 0x267   :  { %511 = vsyncpa [#allocation6], 1 }
 0x268   :  { %512 = vsyncpa [#allocation9], 1 }
 0x269   :  { %513 = vsyncpa [#allocation4], 1 }

</bundles_post_ra>
